<compile_context>
chip_gen: v5e
topology: v5e:2x2
jax: 0.10.0
libtpu: 0.0.40
codegen_flags: <defaults>
</compile_context>

<pallas_src>
import math
import functools

import jax
import jax.numpy as jnp
from jax import lax
from jax.experimental import pallas as pl
from jax.experimental.pallas import tpu as pltpu

# ----------------------------- model config ---------------------------------
L = 8          # sequence length
B = 2          # batch
D_MODEL = 32   # d_model
NHEAD = 4
HEAD_DIM = D_MODEL // NHEAD
D_FF = 64      # dim_feedforward
LN_EPS = 1e-5  # nn.LayerNorm default


# ------------------------------- kernel -------------------------------------
def _encoder_layer_kernel(
    x_ref, pos_ref, mask_ref,
    wqk_ref, bqk_ref, wv_ref, wo_ref,
    w1_ref, b1_ref, w2_ref, vecs_ref,
    out_ref,
    *, nhead, head_dim, d_model,
):
    f32 = jnp.float32
    m = x_ref.shape[0]              # B*L rows (static)

    x = x_ref[...]                  # (M, D)   rows ordered (l, b)
    pos = pos_ref[...]              # (M, D)
    mask = mask_ref[...]            # (M, M)   combined additive mask

    # packed (D,)-wide vectors
    bv, bo, b2 = vecs_ref[0:1], vecs_ref[1:2], vecs_ref[2:3]
    g1, beta1 = vecs_ref[3:4], vecs_ref[4:5]
    g2, beta2 = vecs_ref[5:6], vecs_ref[6:7]

    # ---- fused Q|K projection (scale folded into wq/bq) + V projection -----
    qk_in = x + pos
    qk = jnp.dot(qk_in, wqk_ref[...], preferred_element_type=f32) + bqk_ref[...]  # (M, 2D)
    v = jnp.dot(x, wv_ref[...], preferred_element_type=f32) + bv                   # (M, D)

    # ---- attention scores: per-head (static loop), batch handled by the mask ----
    dn = (((1,), (1,)), ((), ()))   # contract last dims: q @ k^T without explicit .T
    scores = []
    for h in range(nhead):
        q_h = qk[:, h * head_dim:(h + 1) * head_dim]                     # (M, hd)
        k_h = qk[:, d_model + h * head_dim:d_model + (h + 1) * head_dim]  # (M, hd)
        s = lax.dot_general(q_h, k_h, dn, preferred_element_type=f32)    # (M, M)
        scores.append(s + mask)

    # ---- one softmax pass over all heads (sublane-stacked) ------------------
    s_all = jnp.concatenate(scores, axis=0)                              # (H*M, M)
    s_all = s_all - jnp.max(s_all, axis=-1, keepdims=True)
    p_all = jnp.exp(s_all)
    p_all = p_all * pl.reciprocal(jnp.sum(p_all, axis=-1, keepdims=True), approx=False)

    # ---- PV + output projection, accumulated through wo row-blocks ----------
    attn = None
    for h in range(nhead):
        hs = slice(h * head_dim, (h + 1) * head_dim)
        p_h = p_all[h * m:(h + 1) * m, :]                                # (M, M)
        o_h = jnp.dot(p_h, v[:, hs], preferred_element_type=f32)         # (M, hd)
        proj = jnp.dot(o_h, wo_ref[hs, :], preferred_element_type=f32)   # (M, D)
        attn = proj if attn is None else attn + proj
    attn = attn + bo

    # ---- residual + LayerNorm1 (dropout1 = identity) -------------------------
    y = x + attn
    mu = jnp.mean(y, axis=-1, keepdims=True)
    var = jnp.mean((y - mu) ** 2, axis=-1, keepdims=True)
    y = (y - mu) * lax.rsqrt(var + LN_EPS) * g1 + beta1

    # ---- feed-forward ---------------------------------------------------------
    h1 = jnp.maximum(jnp.dot(y, w1_ref[...], preferred_element_type=f32) + b1_ref[...], 0.0)
    h2 = jnp.dot(h1, w2_ref[...], preferred_element_type=f32) + b2

    # ---- residual + LayerNorm2 (dropout/dropout2 = identity) ------------------
    z = y + h2
    mu2 = jnp.mean(z, axis=-1, keepdims=True)
    var2 = jnp.mean((z - mu2) ** 2, axis=-1, keepdims=True)
    out_ref[...] = (z - mu2) * lax.rsqrt(var2 + LN_EPS) * g2 + beta2


# ------------------------------- wrapper -------------------------------------
def transformer_encoder_layer(src, src_mask, pos, params):
    """src, pos: (L, B, D) float32; src_mask: (L, L) additive float mask."""
    seq, bsz, d = src.shape
    m = seq * bsz

    # (L, B, D) -> (L*B, D): row-major view, no data movement, no transpose.
    x = src.reshape(m, d)
    pe = pos.reshape(m, d)

    # Combined (M, M) additive mask: src_mask[i//B, j//B] for same-batch pairs,
    # -1e30 (-> exp underflows to exactly 0) for cross-batch pairs.
    mask_mm = jnp.repeat(jnp.repeat(src_mask.astype(jnp.float32), bsz, axis=0), bsz, axis=1)
    ids = jnp.arange(m) % bsz
    mask_mm = jnp.where(ids[:, None] == ids[None, :], mask_mm, jnp.float32(-1e30))

    kernel = functools.partial(
        _encoder_layer_kernel, nhead=NHEAD, head_dim=HEAD_DIM, d_model=d)

    def full(shape):
        z = (0,) * len(shape)
        return pl.BlockSpec(shape, lambda i, _z=z: _z)

    in_arrays = (
        x, pe, mask_mm,
        params["w_qk"], params["b_qk"], params["w_v"], params["w_o"],
        params["w_1"], params["b_1"], params["w_2"], params["vecs_d"],
    )
    in_specs = [full(a.shape) for a in in_arrays]

    out = pl.pallas_call(
        kernel,
        out_shape=jax.ShapeDtypeStruct((m, d), jnp.float32),
        grid_spec=pltpu.PrefetchScalarGridSpec(
            num_scalar_prefetch=0,
            grid=(1,),                         # whole layer in one step
            in_specs=in_specs,
            out_specs=full((m, d)),
        ),
        compiler_params=pltpu.CompilerParams(
            dimension_semantics=("arbitrary",)),
    )(*in_arrays)

    return out.reshape(seq, bsz, d)            # free view back to (L, B, D)


# ----------------------- pure-JAX reference (for check) ----------------------
def reference_forward(src, src_mask, pos, p):
    x = jnp.transpose(src, (1, 0, 2))    # (B, L, D)
    pe = jnp.transpose(pos, (1, 0, 2))
    bsz, seq, d = x.shape
    qk = x + pe
    q = qk @ p["wq_t"] + p["bq"]
    k = qk @ p["wk_t"] + p["bk"]
    v = x @ p["wv_t"] + p["bv"]
    hd = HEAD_DIM

    def split(t):
        return t.reshape(bsz, seq, NHEAD, hd).transpose(0, 2, 1, 3)

    qh = split(q) * (1.0 / math.sqrt(hd))
    kh, vh = split(k), split(v)
    s = jnp.einsum("bhqd,bhkd->bhqk", qh, kh) + src_mask
    a = jax.nn.softmax(s, axis=-1)
    o = jnp.einsum("bhqk,bhkd->bhqd", a, vh).transpose(0, 2, 1, 3).reshape(bsz, seq, d)
    o = o @ p["wo_t"] + p["bo"]

    def ln(t, g, b):
        mu = jnp.mean(t, axis=-1, keepdims=True)
        var = jnp.mean((t - mu) ** 2, axis=-1, keepdims=True)
        return (t - mu) / jnp.sqrt(var + LN_EPS) * g + b

    y = ln(x + o, p["g1"], p["beta1"])
    ff = jnp.maximum(y @ p["w1_t"] + p["b1"], 0.0) @ p["w2_t"] + p["b2"]
    z = ln(y + ff, p["g2"], p["beta2"])
    return jnp.transpose(z, (1, 0, 2))


# --------------------------------- main ---------------------------------------
if __name__ == "__main__":
    key = jax.random.PRNGKey(0)
    ks = jax.random.split(key, 24)
    d, dff, hd = D_MODEL, D_FF, HEAD_DIM

    def nrm(k, shape, s=0.05):
        return jax.random.normal(k, shape, jnp.float32) * s

    # nn.MultiheadAttention in_proj_weight (3D, D) split into q/k/v (pre-transposed).
    in_proj_w = nrm(ks[0], (3 * d, d))
    in_proj_b = nrm(ks[1], (3 * d,))
    wq_t, wk_t, wv_t = in_proj_w[0:d].T, in_proj_w[d:2 * d].T, in_proj_w[2 * d:3 * d].T
    bq, bk, bv = in_proj_b[0:d], in_proj_b[d:2 * d], in_proj_b[2 * d:3 * d]
    wo_t = nrm(ks[2], (d, d)).T
    bo = nrm(ks[3], (d,))
    w1_t = nrm(ks[4], (dff, d)).T
    b1 = nrm(ks[5], (dff,))
    w2_t = nrm(ks[6], (d, dff)).T
    b2 = nrm(ks[7], (d,))
    g1 = 1.0 + nrm(ks[8], (d,))
    beta1 = nrm(ks[9], (d,))
    g2 = 1.0 + nrm(ks[10], (d,))
    beta2 = nrm(ks[11], (d,))

    raw = dict(wq_t=wq_t, wk_t=wk_t, wv_t=wv_t, bq=bq, bk=bk, bv=bv,
               wo_t=wo_t, bo=bo, w1_t=w1_t, b1=b1, w2_t=w2_t, b2=b2,
               g1=g1, beta1=beta1, g2=g2, beta2=beta2)

    # One-time packing for the kernel: fuse Q|K weights, fold the 1/sqrt(hd)
    # softmax scale into wq/bq, and stack all (D,)-wide vectors into one block.
    scale = 1.0 / math.sqrt(hd)
    packed = {
        "w_qk": jnp.concatenate([wq_t * scale, wk_t], axis=1),           # (D, 2D)
        "b_qk": jnp.concatenate([bq * scale, bk]).reshape(1, 2 * d),     # (1, 2D)
        "w_v": wv_t,                                                     # (D, D)
        "w_o": wo_t,                                                     # (D, D)
        "w_1": w1_t,                                                     # (D, D_FF)
        "b_1": b1.reshape(1, dff),                                       # (1, D_FF)
        "w_2": w2_t,                                                     # (D_FF, D)
        "vecs_d": jnp.stack([bv, bo, b2, g1, beta1, g2, beta2], axis=0),  # (7, D)
    }

    src = jax.random.normal(ks[12], (L, B, D_MODEL), jnp.float32)
    pos = jax.random.normal(ks[13], (L, B, D_MODEL), jnp.float32)
    src_mask = jax.random.uniform(ks[14], (L, L), jnp.float32) * 0.1     # additive float mask

    fwd = jax.jit(transformer_encoder_layer)
    out = jax.block_until_ready(fwd(src, src_mask, pos, packed))

    ref = reference_forward(src, src_mask, pos, raw)
    assert out.shape == (L, B, D_MODEL)
    assert jnp.allclose(out, ref, atol=1e-4, rtol=1e-4), "mismatch vs pure-JAX reference"

    print("KERNEL_OK")
</pallas_src>

<mosaic_0001>
module attributes {stable_mosaic.version = 11 : i64} {
  func.func @_encoder_layer_kernel(%arg0: i32, %arg1: memref<16x32xf32, #tpu.memory_space<vmem>>, %arg2: memref<16x32xf32, #tpu.memory_space<vmem>>, %arg3: memref<16x16xf32, #tpu.memory_space<vmem>>, %arg4: memref<32x64xf32, #tpu.memory_space<vmem>>, %arg5: memref<1x64xf32, #tpu.memory_space<vmem>>, %arg6: memref<32x32xf32, #tpu.memory_space<vmem>>, %arg7: memref<32x32xf32, #tpu.memory_space<vmem>>, %arg8: memref<32x64xf32, #tpu.memory_space<vmem>>, %arg9: memref<1x64xf32, #tpu.memory_space<vmem>>, %arg10: memref<64x32xf32, #tpu.memory_space<vmem>>, %arg11: memref<7x32xf32, #tpu.memory_space<vmem>>, %arg12: memref<16x32xf32, #tpu.memory_space<vmem>>) attributes {dimension_semantics = [#tpu.dimension_semantics<arbitrary>], iteration_bounds = array<i64: 1>, scalar_prefetch = 0 : i64, scratch_operands = 0 : i64, tpu.core_type = #tpu.core_type<tc>, window_params = [{pipeline_mode = #tpu.pipeline_mode<synchronous>, transform_indices = @transform_0, window_bounds = array<i64: 16, 32>}, {pipeline_mode = #tpu.pipeline_mode<synchronous>, transform_indices = @transform_1, window_bounds = array<i64: 16, 32>}, {pipeline_mode = #tpu.pipeline_mode<synchronous>, transform_indices = @transform_2, window_bounds = array<i64: 16, 16>}, {pipeline_mode = #tpu.pipeline_mode<synchronous>, transform_indices = @transform_3, window_bounds = array<i64: 32, 64>}, {pipeline_mode = #tpu.pipeline_mode<synchronous>, transform_indices = @transform_4, window_bounds = array<i64: 1, 64>}, {pipeline_mode = #tpu.pipeline_mode<synchronous>, transform_indices = @transform_5, window_bounds = array<i64: 32, 32>}, {pipeline_mode = #tpu.pipeline_mode<synchronous>, transform_indices = @transform_6, window_bounds = array<i64: 32, 32>}, {pipeline_mode = #tpu.pipeline_mode<synchronous>, transform_indices = @transform_7, window_bounds = array<i64: 32, 64>}, {pipeline_mode = #tpu.pipeline_mode<synchronous>, transform_indices = @transform_8, window_bounds = array<i64: 1, 64>}, {pipeline_mode = #tpu.pipeline_mode<synchronous>, transform_indices = @transform_9, window_bounds = array<i64: 64, 32>}, {pipeline_mode = #tpu.pipeline_mode<synchronous>, transform_indices = @transform_10, window_bounds = array<i64: 7, 32>}, {pipeline_mode = #tpu.pipeline_mode<synchronous>, transform_indices = @transform_11, window_bounds = array<i64: 16, 32>}]} {
    %c0 = arith.constant 0 : index
    %c0_0 = arith.constant 0 : index
    %0 = vector.load %arg1[%c0, %c0_0] : memref<16x32xf32, #tpu.memory_space<vmem>>, vector<16x32xf32>
    %c0_1 = arith.constant 0 : index
    %c0_2 = arith.constant 0 : index
    %1 = vector.load %arg2[%c0_1, %c0_2] : memref<16x32xf32, #tpu.memory_space<vmem>>, vector<16x32xf32>
    %c0_3 = arith.constant 0 : index
    %c0_4 = arith.constant 0 : index
    %2 = vector.load %arg3[%c0_3, %c0_4] : memref<16x16xf32, #tpu.memory_space<vmem>>, vector<16x16xf32>
    %c0_5 = arith.constant 0 : index
    %c0_6 = arith.constant 0 : index
    %3 = vector.load %arg11[%c0_5, %c0_6] : memref<7x32xf32, #tpu.memory_space<vmem>>, vector<1x32xf32>
    %c1 = arith.constant 1 : index
    %c0_7 = arith.constant 0 : index
    %4 = vector.load %arg11[%c1, %c0_7] : memref<7x32xf32, #tpu.memory_space<vmem>>, vector<1x32xf32>
    %c2 = arith.constant 2 : index
    %c0_8 = arith.constant 0 : index
    %5 = vector.load %arg11[%c2, %c0_8] : memref<7x32xf32, #tpu.memory_space<vmem>>, vector<1x32xf32>
    %c3 = arith.constant 3 : index
    %c0_9 = arith.constant 0 : index
    %6 = vector.load %arg11[%c3, %c0_9] : memref<7x32xf32, #tpu.memory_space<vmem>>, vector<1x32xf32>
    %c4 = arith.constant 4 : index
    %c0_10 = arith.constant 0 : index
    %7 = vector.load %arg11[%c4, %c0_10] : memref<7x32xf32, #tpu.memory_space<vmem>>, vector<1x32xf32>
    %c5 = arith.constant 5 : index
    %c0_11 = arith.constant 0 : index
    %8 = vector.load %arg11[%c5, %c0_11] : memref<7x32xf32, #tpu.memory_space<vmem>>, vector<1x32xf32>
    %c6 = arith.constant 6 : index
    %c0_12 = arith.constant 0 : index
    %9 = vector.load %arg11[%c6, %c0_12] : memref<7x32xf32, #tpu.memory_space<vmem>>, vector<1x32xf32>
    %10 = arith.addf %0, %1 : vector<16x32xf32>
    %c0_13 = arith.constant 0 : index
    %c0_14 = arith.constant 0 : index
    %11 = vector.load %arg4[%c0_13, %c0_14] : memref<32x64xf32, #tpu.memory_space<vmem>>, vector<32x64xf32>
    %cst = arith.constant dense<0.000000e+00> : vector<16x64xf32>
    %12 = tpu.matmul %10, %11, %cst {dimension_numbers = #tpu.dot_dimension_numbers<[1], [0], [0], [1], [0, 0, 1, 1], [], []>} : vector<16x32xf32>, vector<32x64xf32>, vector<16x64xf32> -> vector<16x64xf32>
    %c0_15 = arith.constant 0 : index
    %c0_16 = arith.constant 0 : index
    %13 = vector.load %arg5[%c0_15, %c0_16] : memref<1x64xf32, #tpu.memory_space<vmem>>, vector<1x64xf32>
    %14 = vector.broadcast %13 : vector<1x64xf32> to vector<16x64xf32>
    %15 = arith.addf %12, %14 : vector<16x64xf32>
    %c0_17 = arith.constant 0 : index
    %c0_18 = arith.constant 0 : index
    %16 = vector.load %arg6[%c0_17, %c0_18] : memref<32x32xf32, #tpu.memory_space<vmem>>, vector<32x32xf32>
    %cst_19 = arith.constant dense<0.000000e+00> : vector<16x32xf32>
    %17 = tpu.matmul %0, %16, %cst_19 {dimension_numbers = #tpu.dot_dimension_numbers<[1], [0], [0], [1], [0, 0, 1, 1], [], []>} : vector<16x32xf32>, vector<32x32xf32>, vector<16x32xf32> -> vector<16x32xf32>
    %18 = vector.broadcast %3 : vector<1x32xf32> to vector<16x32xf32>
    %19 = arith.addf %17, %18 : vector<16x32xf32>
    %20 = vector.extract_strided_slice %15 {offsets = [0, 0], sizes = [16, 8], strides = [1, 1]} : vector<16x64xf32> to vector<16x8xf32>
    %21 = vector.extract_strided_slice %15 {offsets = [0, 32], sizes = [16, 8], strides = [1, 1]} : vector<16x64xf32> to vector<16x8xf32>
    %cst_20 = arith.constant dense<0.000000e+00> : vector<16x16xf32>
    %22 = tpu.matmul %20, %21, %cst_20 {dimension_numbers = #tpu.dot_dimension_numbers<[1], [1], [0], [0], [0, 0, 1, 0], [], []>} : vector<16x8xf32>, vector<16x8xf32>, vector<16x16xf32> -> vector<16x16xf32>
    %23 = arith.addf %22, %2 : vector<16x16xf32>
    %24 = vector.extract_strided_slice %15 {offsets = [0, 8], sizes = [16, 8], strides = [1, 1]} : vector<16x64xf32> to vector<16x8xf32>
    %25 = vector.extract_strided_slice %15 {offsets = [0, 40], sizes = [16, 8], strides = [1, 1]} : vector<16x64xf32> to vector<16x8xf32>
    %cst_21 = arith.constant dense<0.000000e+00> : vector<16x16xf32>
    %26 = tpu.matmul %24, %25, %cst_21 {dimension_numbers = #tpu.dot_dimension_numbers<[1], [1], [0], [0], [0, 0, 1, 0], [], []>} : vector<16x8xf32>, vector<16x8xf32>, vector<16x16xf32> -> vector<16x16xf32>
    %27 = arith.addf %26, %2 : vector<16x16xf32>
    %28 = vector.extract_strided_slice %15 {offsets = [0, 16], sizes = [16, 8], strides = [1, 1]} : vector<16x64xf32> to vector<16x8xf32>
    %29 = vector.extract_strided_slice %15 {offsets = [0, 48], sizes = [16, 8], strides = [1, 1]} : vector<16x64xf32> to vector<16x8xf32>
    %cst_22 = arith.constant dense<0.000000e+00> : vector<16x16xf32>
    %30 = tpu.matmul %28, %29, %cst_22 {dimension_numbers = #tpu.dot_dimension_numbers<[1], [1], [0], [0], [0, 0, 1, 0], [], []>} : vector<16x8xf32>, vector<16x8xf32>, vector<16x16xf32> -> vector<16x16xf32>
    %31 = arith.addf %30, %2 : vector<16x16xf32>
    %32 = vector.extract_strided_slice %15 {offsets = [0, 24], sizes = [16, 8], strides = [1, 1]} : vector<16x64xf32> to vector<16x8xf32>
    %33 = vector.extract_strided_slice %15 {offsets = [0, 56], sizes = [16, 8], strides = [1, 1]} : vector<16x64xf32> to vector<16x8xf32>
    %cst_23 = arith.constant dense<0.000000e+00> : vector<16x16xf32>
    %34 = tpu.matmul %32, %33, %cst_23 {dimension_numbers = #tpu.dot_dimension_numbers<[1], [1], [0], [0], [0, 0, 1, 0], [], []>} : vector<16x8xf32>, vector<16x8xf32>, vector<16x16xf32> -> vector<16x16xf32>
    %35 = arith.addf %34, %2 : vector<16x16xf32>
    %36 = tpu.concatenate %23, %27, %31, %35 in 0 : vector<16x16xf32>, vector<16x16xf32>, vector<16x16xf32>, vector<16x16xf32> -> vector<64x16xf32>
    %cst_24 = arith.constant dense<0xFF800000> : vector<64xf32>
    %37 = vector.multi_reduction <maximumf>, %36, %cst_24 [1] : vector<64x16xf32> to vector<64xf32>
    %38 = vector.shape_cast %37 : vector<64xf32> to vector<64x1xf32>
    %39 = vector.broadcast %38 : vector<64x1xf32> to vector<64x16xf32>
    %40 = arith.subf %36, %39 : vector<64x16xf32>
    %41 = math.exp %40 : vector<64x16xf32>
    %cst_25 = arith.constant dense<0.000000e+00> : vector<64xf32>
    %42 = vector.multi_reduction <add>, %41, %cst_25 [1] : vector<64x16xf32> to vector<64xf32>
    %43 = vector.shape_cast %42 : vector<64xf32> to vector<64x1xf32>
    %44 = tpu.reciprocal %43 : vector<64x1xf32> -> vector<64x1xf32>
    %45 = vector.broadcast %44 : vector<64x1xf32> to vector<64x16xf32>
    %46 = arith.mulf %41, %45 : vector<64x16xf32>
    %47 = vector.extract_strided_slice %46 {offsets = [0, 0], sizes = [16, 16], strides = [1, 1]} : vector<64x16xf32> to vector<16x16xf32>
    %48 = vector.extract_strided_slice %19 {offsets = [0, 0], sizes = [16, 8], strides = [1, 1]} : vector<16x32xf32> to vector<16x8xf32>
    %cst_26 = arith.constant dense<0.000000e+00> : vector<16x8xf32>
    %49 = tpu.matmul %47, %48, %cst_26 {dimension_numbers = #tpu.dot_dimension_numbers<[1], [0], [0], [1], [0, 0, 1, 1], [], []>} : vector<16x16xf32>, vector<16x8xf32>, vector<16x8xf32> -> vector<16x8xf32>
    %c0_27 = arith.constant 0 : index
    %c0_28 = arith.constant 0 : index
    %50 = vector.load %arg7[%c0_27, %c0_28] : memref<32x32xf32, #tpu.memory_space<vmem>>, vector<8x32xf32>
    %cst_29 = arith.constant dense<0.000000e+00> : vector<16x32xf32>
    %51 = tpu.matmul %49, %50, %cst_29 {dimension_numbers = #tpu.dot_dimension_numbers<[1], [0], [0], [1], [0, 0, 1, 1], [], []>} : vector<16x8xf32>, vector<8x32xf32>, vector<16x32xf32> -> vector<16x32xf32>
    %52 = vector.extract_strided_slice %46 {offsets = [16, 0], sizes = [16, 16], strides = [1, 1]} : vector<64x16xf32> to vector<16x16xf32>
    %53 = vector.extract_strided_slice %19 {offsets = [0, 8], sizes = [16, 8], strides = [1, 1]} : vector<16x32xf32> to vector<16x8xf32>
    %cst_30 = arith.constant dense<0.000000e+00> : vector<16x8xf32>
    %54 = tpu.matmul %52, %53, %cst_30 {dimension_numbers = #tpu.dot_dimension_numbers<[1], [0], [0], [1], [0, 0, 1, 1], [], []>} : vector<16x16xf32>, vector<16x8xf32>, vector<16x8xf32> -> vector<16x8xf32>
    %c8 = arith.constant 8 : index
    %c0_31 = arith.constant 0 : index
    %55 = vector.load %arg7[%c8, %c0_31] : memref<32x32xf32, #tpu.memory_space<vmem>>, vector<8x32xf32>
    %cst_32 = arith.constant dense<0.000000e+00> : vector<16x32xf32>
    %56 = tpu.matmul %54, %55, %cst_32 {dimension_numbers = #tpu.dot_dimension_numbers<[1], [0], [0], [1], [0, 0, 1, 1], [], []>} : vector<16x8xf32>, vector<8x32xf32>, vector<16x32xf32> -> vector<16x32xf32>
    %57 = arith.addf %51, %56 : vector<16x32xf32>
    %58 = vector.extract_strided_slice %46 {offsets = [32, 0], sizes = [16, 16], strides = [1, 1]} : vector<64x16xf32> to vector<16x16xf32>
    %59 = vector.extract_strided_slice %19 {offsets = [0, 16], sizes = [16, 8], strides = [1, 1]} : vector<16x32xf32> to vector<16x8xf32>
    %cst_33 = arith.constant dense<0.000000e+00> : vector<16x8xf32>
    %60 = tpu.matmul %58, %59, %cst_33 {dimension_numbers = #tpu.dot_dimension_numbers<[1], [0], [0], [1], [0, 0, 1, 1], [], []>} : vector<16x16xf32>, vector<16x8xf32>, vector<16x8xf32> -> vector<16x8xf32>
    %c16 = arith.constant 16 : index
    %c0_34 = arith.constant 0 : index
    %61 = vector.load %arg7[%c16, %c0_34] : memref<32x32xf32, #tpu.memory_space<vmem>>, vector<8x32xf32>
    %cst_35 = arith.constant dense<0.000000e+00> : vector<16x32xf32>
    %62 = tpu.matmul %60, %61, %cst_35 {dimension_numbers = #tpu.dot_dimension_numbers<[1], [0], [0], [1], [0, 0, 1, 1], [], []>} : vector<16x8xf32>, vector<8x32xf32>, vector<16x32xf32> -> vector<16x32xf32>
    %63 = arith.addf %57, %62 : vector<16x32xf32>
    %64 = vector.extract_strided_slice %46 {offsets = [48, 0], sizes = [16, 16], strides = [1, 1]} : vector<64x16xf32> to vector<16x16xf32>
    %65 = vector.extract_strided_slice %19 {offsets = [0, 24], sizes = [16, 8], strides = [1, 1]} : vector<16x32xf32> to vector<16x8xf32>
    %cst_36 = arith.constant dense<0.000000e+00> : vector<16x8xf32>
    %66 = tpu.matmul %64, %65, %cst_36 {dimension_numbers = #tpu.dot_dimension_numbers<[1], [0], [0], [1], [0, 0, 1, 1], [], []>} : vector<16x16xf32>, vector<16x8xf32>, vector<16x8xf32> -> vector<16x8xf32>
    %c24 = arith.constant 24 : index
    %c0_37 = arith.constant 0 : index
    %67 = vector.load %arg7[%c24, %c0_37] : memref<32x32xf32, #tpu.memory_space<vmem>>, vector<8x32xf32>
    %cst_38 = arith.constant dense<0.000000e+00> : vector<16x32xf32>
    %68 = tpu.matmul %66, %67, %cst_38 {dimension_numbers = #tpu.dot_dimension_numbers<[1], [0], [0], [1], [0, 0, 1, 1], [], []>} : vector<16x8xf32>, vector<8x32xf32>, vector<16x32xf32> -> vector<16x32xf32>
    %69 = arith.addf %63, %68 : vector<16x32xf32>
    %70 = vector.broadcast %4 : vector<1x32xf32> to vector<16x32xf32>
    %71 = arith.addf %69, %70 : vector<16x32xf32>
    %72 = arith.addf %0, %71 : vector<16x32xf32>
    %cst_39 = arith.constant dense<0.000000e+00> : vector<16xf32>
    %73 = vector.multi_reduction <add>, %72, %cst_39 [1] : vector<16x32xf32> to vector<16xf32>
    %74 = vector.shape_cast %73 : vector<16xf32> to vector<16x1xf32>
    %cst_40 = arith.constant 3.200000e+01 : f32
    %75 = vector.broadcast %cst_40 : f32 to vector<16x1xf32>
    %76 = arith.divf %74, %75 : vector<16x1xf32>
    %77 = vector.broadcast %76 : vector<16x1xf32> to vector<16x32xf32>
    %78 = arith.subf %72, %77 : vector<16x32xf32>
    %79 = arith.mulf %78, %78 : vector<16x32xf32>
    %cst_41 = arith.constant dense<0.000000e+00> : vector<16xf32>
    %80 = vector.multi_reduction <add>, %79, %cst_41 [1] : vector<16x32xf32> to vector<16xf32>
    %81 = vector.shape_cast %80 : vector<16xf32> to vector<16x1xf32>
    %cst_42 = arith.constant 3.200000e+01 : f32
    %82 = vector.broadcast %cst_42 : f32 to vector<16x1xf32>
    %83 = arith.divf %81, %82 : vector<16x1xf32>
    %84 = vector.broadcast %76 : vector<16x1xf32> to vector<16x32xf32>
    %85 = arith.subf %72, %84 : vector<16x32xf32>
    %cst_43 = arith.constant 9.99999974E-6 : f32
    %86 = vector.broadcast %cst_43 : f32 to vector<16x1xf32>
    %87 = arith.addf %83, %86 : vector<16x1xf32>
    %88 = math.rsqrt %87 : vector<16x1xf32>
    %89 = vector.broadcast %88 : vector<16x1xf32> to vector<16x32xf32>
    %90 = arith.mulf %85, %89 : vector<16x32xf32>
    %91 = vector.broadcast %6 : vector<1x32xf32> to vector<16x32xf32>
    %92 = arith.mulf %90, %91 : vector<16x32xf32>
    %93 = vector.broadcast %7 : vector<1x32xf32> to vector<16x32xf32>
    %94 = arith.addf %92, %93 : vector<16x32xf32>
    %c0_44 = arith.constant 0 : index
    %c0_45 = arith.constant 0 : index
    %95 = vector.load %arg8[%c0_44, %c0_45] : memref<32x64xf32, #tpu.memory_space<vmem>>, vector<32x64xf32>
    %cst_46 = arith.constant dense<0.000000e+00> : vector<16x64xf32>
    %96 = tpu.matmul %94, %95, %cst_46 {dimension_numbers = #tpu.dot_dimension_numbers<[1], [0], [0], [1], [0, 0, 1, 1], [], []>} : vector<16x32xf32>, vector<32x64xf32>, vector<16x64xf32> -> vector<16x64xf32>
    %c0_47 = arith.constant 0 : index
    %c0_48 = arith.constant 0 : index
    %97 = vector.load %arg9[%c0_47, %c0_48] : memref<1x64xf32, #tpu.memory_space<vmem>>, vector<1x64xf32>
    %98 = vector.broadcast %97 : vector<1x64xf32> to vector<16x64xf32>
    %99 = arith.addf %96, %98 : vector<16x64xf32>
    %cst_49 = arith.constant 0.000000e+00 : f32
    %100 = vector.broadcast %cst_49 : f32 to vector<16x64xf32>
    %101 = arith.maximumf %99, %100 : vector<16x64xf32>
    %c0_50 = arith.constant 0 : index
    %c0_51 = arith.constant 0 : index
    %102 = vector.load %arg10[%c0_50, %c0_51] : memref<64x32xf32, #tpu.memory_space<vmem>>, vector<64x32xf32>
    %cst_52 = arith.constant dense<0.000000e+00> : vector<16x32xf32>
    %103 = tpu.matmul %101, %102, %cst_52 {dimension_numbers = #tpu.dot_dimension_numbers<[1], [0], [0], [1], [0, 0, 1, 1], [], []>} : vector<16x64xf32>, vector<64x32xf32>, vector<16x32xf32> -> vector<16x32xf32>
    %104 = vector.broadcast %5 : vector<1x32xf32> to vector<16x32xf32>
    %105 = arith.addf %103, %104 : vector<16x32xf32>
    %106 = arith.addf %94, %105 : vector<16x32xf32>
    %cst_53 = arith.constant dense<0.000000e+00> : vector<16xf32>
    %107 = vector.multi_reduction <add>, %106, %cst_53 [1] : vector<16x32xf32> to vector<16xf32>
    %108 = vector.shape_cast %107 : vector<16xf32> to vector<16x1xf32>
    %cst_54 = arith.constant 3.200000e+01 : f32
    %109 = vector.broadcast %cst_54 : f32 to vector<16x1xf32>
    %110 = arith.divf %108, %109 : vector<16x1xf32>
    %111 = vector.broadcast %110 : vector<16x1xf32> to vector<16x32xf32>
    %112 = arith.subf %106, %111 : vector<16x32xf32>
    %113 = arith.mulf %112, %112 : vector<16x32xf32>
    %cst_55 = arith.constant dense<0.000000e+00> : vector<16xf32>
    %114 = vector.multi_reduction <add>, %113, %cst_55 [1] : vector<16x32xf32> to vector<16xf32>
    %115 = vector.shape_cast %114 : vector<16xf32> to vector<16x1xf32>
    %cst_56 = arith.constant 3.200000e+01 : f32
    %116 = vector.broadcast %cst_56 : f32 to vector<16x1xf32>
    %117 = arith.divf %115, %116 : vector<16x1xf32>
    %118 = vector.broadcast %110 : vector<16x1xf32> to vector<16x32xf32>
    %119 = arith.subf %106, %118 : vector<16x32xf32>
    %cst_57 = arith.constant 9.99999974E-6 : f32
    %120 = vector.broadcast %cst_57 : f32 to vector<16x1xf32>
    %121 = arith.addf %117, %120 : vector<16x1xf32>
    %122 = math.rsqrt %121 : vector<16x1xf32>
    %123 = vector.broadcast %122 : vector<16x1xf32> to vector<16x32xf32>
    %124 = arith.mulf %119, %123 : vector<16x32xf32>
    %125 = vector.broadcast %8 : vector<1x32xf32> to vector<16x32xf32>
    %126 = arith.mulf %124, %125 : vector<16x32xf32>
    %127 = vector.broadcast %9 : vector<1x32xf32> to vector<16x32xf32>
    %128 = arith.addf %126, %127 : vector<16x32xf32>
    %c0_58 = arith.constant 0 : index
    %c0_59 = arith.constant 0 : index
    %129 = vector.load %arg12[%c0_58, %c0_59] : memref<16x32xf32, #tpu.memory_space<vmem>>, vector<16x32xf32>
    tpu.vector_store %arg12[%c0_58, %c0_59], %128 {strides = array<i32>} : memref<16x32xf32, #tpu.memory_space<vmem>>, vector<16x32xf32>,
    return
  }
  func.func @transform_0(%arg0: i32) -> (i32, i32) {
    %c0_i32 = arith.constant 0 : i32
    %c0_i32_0 = arith.constant 0 : i32
    %c0_i32_1 = arith.constant 0 : i32
    return %c0_i32, %c0_i32_0 : i32, i32
  }
  func.func @transform_1(%arg0: i32) -> (i32, i32) {
    %c0_i32 = arith.constant 0 : i32
    %c0_i32_0 = arith.constant 0 : i32
    %c0_i32_1 = arith.constant 0 : i32
    return %c0_i32, %c0_i32_0 : i32, i32
  }
  func.func @transform_2(%arg0: i32) -> (i32, i32) {
    %c0_i32 = arith.constant 0 : i32
    %c0_i32_0 = arith.constant 0 : i32
    %c0_i32_1 = arith.constant 0 : i32
    return %c0_i32, %c0_i32_0 : i32, i32
  }
  func.func @transform_3(%arg0: i32) -> (i32, i32) {
    %c0_i32 = arith.constant 0 : i32
    %c0_i32_0 = arith.constant 0 : i32
    %c0_i32_1 = arith.constant 0 : i32
    return %c0_i32, %c0_i32_0 : i32, i32
  }
  func.func @transform_4(%arg0: i32) -> (i32, i32) {
    %c0_i32 = arith.constant 0 : i32
    %c0_i32_0 = arith.constant 0 : i32
    %c0_i32_1 = arith.constant 0 : i32
    return %c0_i32, %c0_i32_0 : i32, i32
  }
  func.func @transform_5(%arg0: i32) -> (i32, i32) {
    %c0_i32 = arith.constant 0 : i32
    %c0_i32_0 = arith.constant 0 : i32
    %c0_i32_1 = arith.constant 0 : i32
    return %c0_i32, %c0_i32_0 : i32, i32
  }
  func.func @transform_6(%arg0: i32) -> (i32, i32) {
    %c0_i32 = arith.constant 0 : i32
    %c0_i32_0 = arith.constant 0 : i32
    %c0_i32_1 = arith.constant 0 : i32
    return %c0_i32, %c0_i32_0 : i32, i32
  }
  func.func @transform_7(%arg0: i32) -> (i32, i32) {
    %c0_i32 = arith.constant 0 : i32
    %c0_i32_0 = arith.constant 0 : i32
    %c0_i32_1 = arith.constant 0 : i32
    return %c0_i32, %c0_i32_0 : i32, i32
  }
  func.func @transform_8(%arg0: i32) -> (i32, i32) {
    %c0_i32 = arith.constant 0 : i32
    %c0_i32_0 = arith.constant 0 : i32
    %c0_i32_1 = arith.constant 0 : i32
    return %c0_i32, %c0_i32_0 : i32, i32
  }
  func.func @transform_9(%arg0: i32) -> (i32, i32) {
    %c0_i32 = arith.constant 0 : i32
    %c0_i32_0 = arith.constant 0 : i32
    %c0_i32_1 = arith.constant 0 : i32
    return %c0_i32, %c0_i32_0 : i32, i32
  }
  func.func @transform_10(%arg0: i32) -> (i32, i32) {
    %c0_i32 = arith.constant 0 : i32
    %c0_i32_0 = arith.constant 0 : i32
    %c0_i32_1 = arith.constant 0 : i32
    return %c0_i32, %c0_i32_0 : i32, i32
  }
  func.func @transform_11(%arg0: i32) -> (i32, i32) {
    %c0_i32 = arith.constant 0 : i32
    %c0_i32_0 = arith.constant 0 : i32
    %c0_i32_1 = arith.constant 0 : i32
    return %c0_i32, %c0_i32_0 : i32, i32
  }
}

</mosaic_0001>

<bundles_post_ra>
// kernel: transformer_encoder_layer.1
= control target key start
LH: loop header
LB: loop body
LE: loop exit
PB: predicated region body
PF: predicated region fallthrough
CT: control target
= control target key end

     0   :  { %vm62_vm0 = vcmask 261120   ;;  %s1464_s0 = inlined_call_operand.vmem [shape: f32[16,32], index: 0, kind: input, shape index: {}]   ;;  %s1465_s1 = inlined_call_operand.vmem [shape: f32[16,32], index: 1, kind: input, shape index: {}]   ;;  %s1466_s2 = inlined_call_operand.vmem [shape: f32[16,16], index: 2, kind: input, shape index: {}]   ;;  %s1467_s3 = inlined_call_operand.vmem [shape: f32[32,64], index: 3, kind: input, shape index: {}]   ;;  %s1468_s4 = inlined_call_operand.vmem [shape: f32[1,64], index: 4, kind: input, shape index: {}]   ;;  %s1469_s5 = inlined_call_operand.vmem [shape: f32[32,32], index: 5, kind: input, shape index: {}]   ;;  %s1470_s6 = inlined_call_operand.vmem [shape: f32[32,32], index: 6, kind: input, shape index: {}]   ;;  %s1471_s7 = inlined_call_operand.vmem [shape: f32[32,64], index: 7, kind: input, shape index: {}]   ;;  %s1472_s8 = inlined_call_operand.vmem [shape: f32[1,64], index: 8, kind: input, shape index: {}]   ;;  %s1473_s9 = inlined_call_operand.vmem [shape: f32[64,32], index: 9, kind: input, shape index: {}]   ;;  %s1474_s10 = inlined_call_operand.vmem [shape: f32[7,32], index: 10, kind: input, shape index: {}]   ;;  %s1475_s11 = inlined_call_operand.hbm [shape: f32[16,32], index: 11, kind: output, shape index: {}]  }
   0x1   :  { %v57_v0 = vld [vmem:[%s1467_s3 + $0x18] sm:$0xff]  ;;  %v56_v1 = vld [vmem:[%s1467_s3 + $0x10] sm:$0xff]  ;;  %v1169_v2 = vld [vmem:[%s1464_s0] sm:$0xff] }
   0x2   :  { %81 = vmatpush.msra.mxu0 %v57_v0  ;;  %v41_v3 = vld [vmem:[%s1465_s1] sm:$0xff]  ;;  %v55_v4 = vld [vmem:[%s1467_s3 + $0x8] sm:$0xff] }
   0x3   :  { %v54_v5 = vld [vmem:[%s1467_s3] sm:$0xff]  ;;  %v52_v6 = vadd.f32 %v41_v3, %v1169_v2 }
   0x4   :  { %82 = vmatpush.msra.mxu0 %v56_v1 }
   0x6   :  { %83 = vmatpush.msra.mxu0 %v55_v4 }
   0x7   :  { %16 = vsyncpa [#allocation3], 0  ;;  %v1185_v7 = vld [vmem:[%s1464_s0 + $0x8] sm:$0xff]  ;;  %v1012_v10 = vld [vmem:[%s1468_s4] ss:$0 sm:$0xff]  ;;  %s1089_s15 = smov 120  }
   0x8   :  { %84 = vmatpush.msra.mxu0 %v54_v5  ;;  %v42_v8 = vld [vmem:[%s1465_s1 + $0x8] sm:$0xff]  ;;  %s1090_s0 = smov 96   ;;  %s1091_s16 = smov 88   ;;  %vm132_vm1 = vcmask 64512   ;;  %v95_v16 = vld [vmem:[%s1469_s5 + $0x18] sm:$0xff]  ;;  %v94_v17 = vld [vmem:[%s1469_s5 + $0x10] sm:$0xff] }
   0x9   :  { %946 = vmatmul.msk.f32.vlgmr.msra.gmra.mxu0 %vm62_vm0, %v52_v6  ;;  %v53_v9 = vadd.f32 %v42_v8, %v1185_v7  ;;  %s1092_s1 = smov 80   ;;  %s1093_s17 = smov 112   ;;  %115 = vmatpush.msra.mxu1 %v95_v16  ;;  %v93_v18 = vld [vmem:[%s1469_s5 + $0x8] sm:$0xff]  ;;  %v92_v19 = vld [vmem:[%s1469_s5] sm:$0xff]  ;;  %vm281_vm2 = vcmask 130048  }
   0xa   :  { %s1094_s4 = smov 72   ;;  %s1095_s18 = smov 104   ;;  %v1013_v34 = vld [vmem:[%s1474_s10] ss:$0 sm:$0xff]  ;;  %v44_v42 = vld [vmem:[%s1466_s2 + $0x8] sm:$0xff] }
   0xb   :  { %116 = vmatpush.msra.mxu1 %v94_v17  ;;  %v43_v38 = vld [vmem:[%s1466_s2] sm:$0xff]  ;;  %s1097_s24 = smov [#allocation2]   ;;  %s934_s27 = sshll.u32 %s1475_s11, 4  ;;  %s935_s27 = int_to_ptr.hbm [resolvable:$true] %s934_s27 }
   0xc   :  { %s932_s25 = sshll.u32 %s1097_s24, 4  ;;  %s1099_s28 = smov 8   ;;  %s933_s25 = int_to_ptr.vmem [resolvable:$true] %s932_s25 }
   0xd   :  { %117 = vmatpush.msra.mxu1 %v93_v18 }
   0xf   :  { %118 = vmatpush.msra.mxu1 %v92_v19 }
  0x10   :  { %948 = vmatmul.msk.f32.vlgmr.msra.gmra.mxu1 %vm62_vm0, %v1169_v2 }
  0x11   :  { %947 = vmatmul.msk.f32.gmra.mxu0 %vm62_vm0, %v53_v9 }
  0x18   :  { %949 = vmatmul.msk.f32.gmra.mxu1 %vm62_vm0, %v1185_v7 }
  0x86   :  { %v86_v11 = vpop.f32.mrf.mxu0 }
  0x87   :  { %v87_v12 = vadd.f32 %v1012_v10, %v86_v11 }
  0x89   :  { %164 = vrot.lane.b32.xlu1 %v87_v12, %s1089_s15 }
  0x8d   :  { %v120_v33 = vpop.f32.mrf.mxu1 }
  0x8e   :  { %v89_v13 = vpop.f32.mrf.mxu0  ;;  %v1236_v36 = vadd.f32 %v1013_v34, %v120_v33 }
  0x8f   :  { %v90_v14 = vadd.f32 %v1012_v10, %v89_v13 }
  0x91   :  { %130 = vrot.lane.b32.xlu2 %v90_v14, %s1090_s0  ;;  %170 = vrot.lane.b32.xlu0 %v90_v14, %s1091_s16 }
  0x92   :  { %166 = vrot.lane.b32.xlu1 %v90_v14, %s1089_s15 }
  0x95   :  { %v123_v35 = vpop.f32.mrf.mxu1 }
  0x96   :  { %v124_v37 = vadd.f32 %v1013_v34, %v123_v35 }
  0x99   :  { %128 = vrot.lane.b32.xlu2 %v87_v12, %s1090_s0  ;;  %168 = vrot.lane.b32.xlu0 %v87_v12, %s1091_s16 }
  0x9a   :  { %207 = vrot.lane.b32.xlu1 %v87_v12, %s1092_s1 }
  0xa1   :  { %203 = vrot.lane.b32.xlu2 %v87_v12, %s1093_s17  ;;  %209 = vrot.lane.b32.xlu0 %v90_v14, %s1092_s1 }
  0xa2   :  { %205 = vrot.lane.b32.xlu1 %v90_v14, %s1093_s17 }
  0xa9   :  { %246 = vrot.lane.b32.xlu2 %v87_v12, %s1094_s4  ;;  %248 = vrot.lane.b32.xlu0 %v90_v14, %s1094_s4 }
  0xaa   :  { %244 = vrot.lane.b32.xlu1 %v90_v14, %s1095_s18 }
  0xb1   :  { %242 = vrot.lane.b32.xlu0 %v87_v12, %s1095_s18 }
  0xeb   :  { %v131_v15 = vpop.permute.xlu2 %130 }
  0xec   :  { %950 = vmatpush.xpose.msk.msra.mxu2 %vm132_vm1, %v131_v15 }
  0xf3   :  { %v129_v20 = vpop.permute.xlu2 %128 }
  0xf4   :  { %951 = vmatpush.xpose.msk.msra.mxu2 %vm132_vm1, %v129_v20  ;;  %v1270_v20 = vpack.i.bf16 %v1236_v36, %v124_v37 }
  0xf7   :  { %952 = vmatmul.msk.f32.vlgmr.msra.gmra.mxu2 %vm132_vm1, %v87_v12 }
  0xf8   :  { %494 = vmatpush.msrb.mxu2 %v124_v37 }
  0xfa   :  { %495 = vmatpush.msrb.mxu2 %v1236_v36 }
  0xfb   :  { %v165_v21 = vpop.permute.xlu1 %164  ;;  %v204_v26 = vpop.permute.xlu2 %203 }
  0xff   :  { %953 = vmatmul.msk.f32.gmra.mxu2 %vm132_vm1, %v90_v14 }
 0x103   :  { %v171_v22 = vpop.permute.xlu0 %170  ;;  %v247_v29 = vpop.permute.xlu2 %246 }
 0x104   :  { %954 = vmatpush.xpose.msk.msra.mxu3 %vm132_vm1, %v171_v22  ;;  %v167_v24 = vpop.permute.xlu1 %166 }
 0x10b   :  { %v169_v23 = vpop.permute.xlu0 %168 }
 0x10c   :  { %955 = vmatpush.xpose.msk.msra.mxu3 %vm132_vm1, %v169_v23  ;;  %v208_v27 = vpop.permute.xlu1 %207 }
 0x10f   :  { %956 = vmatmul.msk.f32.vlgmr.msra.gmra.mxu3 %vm132_vm1, %v165_v21 }
 0x113   :  { %v210_v25 = vpop.permute.xlu0 %209 }
 0x114   :  { %958 = vmatpush.xpose.msk.msrb.mxu0 %vm132_vm1, %v210_v25  ;;  %v206_v30 = vpop.permute.xlu1 %205 }
 0x117   :  { %957 = vmatmul.msk.f32.gmra.mxu3 %vm132_vm1, %v167_v24 }
 0x118   :  { %959 = vmatpush.xpose.msk.msrb.mxu0 %vm132_vm1, %v208_v27 }
 0x11b   :  { %960 = vmatmul.msk.f32.vlgmr.msrb.gmra.mxu0 %vm132_vm1, %v204_v26  ;;  %v249_v28 = vpop.permute.xlu0 %248 }
 0x11c   :  { %962 = vmatpush.xpose.msk.msrb.mxu1 %vm132_vm1, %v249_v28  ;;  %v245_v32 = vpop.permute.xlu1 %244 }
 0x120   :  { %963 = vmatpush.xpose.msk.msrb.mxu1 %vm132_vm1, %v247_v29 }
 0x123   :  { %961 = vmatmul.msk.f32.gmra.mxu0 %vm132_vm1, %v206_v30  ;;  %v243_v31 = vpop.permute.xlu0 %242 }
 0x124   :  { %964 = vmatmul.msk.f32.vlgmr.msrb.gmra.mxu1 %vm132_vm1, %v243_v31 }
 0x12c   :  { %965 = vmatmul.msk.f32.gmra.mxu1 %vm132_vm1, %v245_v32 }
 0x17a   :  { %v158_v46 = vpop.f32.mrf.mxu2 }
 0x17b   :  { %v159_v47 = vadd.f32 %v158_v46, %v43_v38 }
 0x17d   :  { %v282_v48 = vsel %vm281_vm2, %v159_v47, -inf }
 0x182   :  { %v161_v63 = vpop.f32.mrf.mxu2 }
 0x183   :  { %v1254_v0 = vadd.f32 %v161_v63, %v44_v42 }
 0x185   :  { %v285_v4 = vsel %vm281_vm2, %v1254_v0, -inf }
 0x192   :  { %v197_v39 = vpop.f32.mrf.mxu3 }
 0x193   :  { %v198_v40 = vadd.f32 %v197_v39, %v43_v38 }
 0x195   :  { %v288_v41 = vsel %vm281_vm2, %v198_v40, -inf }
 0x196   :  { %289 = vmax.xlane.f32.xlu2 %v288_v41 }
 0x198   :  { %v236_v49 = vpop.f32.mrf.mxu0 }
 0x199   :  { %v237_v50 = vadd.f32 %v236_v49, %v43_v38 }
 0x19a   :  { %v200_v43 = vpop.f32.mrf.mxu3 }
 0x19b   :  { %v201_v44 = vadd.f32 %v200_v43, %v44_v42  ;;  %v294_v51 = vsel %vm281_vm2, %v237_v50, -inf }
 0x19d   :  { %v291_v45 = vsel %vm281_vm2, %v201_v44, -inf }
 0x19e   :  { %292 = vmax.xlane.f32.xlu0 %v291_v45 }
 0x1a0   :  { %v239_v6 = vpop.f32.mrf.mxu0 }
 0x1a1   :  { %v275_v52 = vpop.f32.mrf.mxu1  ;;  %v240_v8 = vadd.f32 %v239_v6, %v44_v42 }
 0x1a2   :  { %v276_v53 = vadd.f32 %v275_v52, %v43_v38 }
 0x1a3   :  { %v297_v11 = vsel %vm281_vm2, %v240_v8, -inf }
 0x1a4   :  { %v300_v54 = vsel %vm281_vm2, %v276_v53, -inf }
 0x1a6   :  { %283 = vmax.xlane.f32.xlu0 %v282_v48 }
 0x1a9   :  { %v278_v12 = vpop.f32.mrf.mxu1 }
 0x1aa   :  { %v1263_v14 = vadd.f32 %v278_v12, %v44_v42 }
 0x1ac   :  { %v303_v17 = vsel %vm281_vm2, %v1263_v14, -inf }
 0x1ae   :  { %295 = vmax.xlane.f32.xlu0 %v294_v51 }
 0x1b6   :  { %301 = vmax.xlane.f32.xlu0 %v300_v54 }
 0x209   :  { %v290_v55 = vpop.xlane.xlu2 %289 }
 0x20a   :  { %v308_v56 = vsub.f32 %v198_v40, %v290_v55 }
 0x20c   :  { %v318_v57 = vmul.f32 1.442695, %v308_v56 }
 0x20e   :  { %1021 = vpow2.f32 %v318_v57 }
 0x211   :  { %v293_v58 = vpop.xlane.xlu0 %292 }
 0x212   :  { %v309_v59 = vsub.f32 %v201_v44, %v293_v58 }
 0x214   :  { %v1250_v60 = vpop.eup %1021  ;;  %v320_v61 = vmul.f32 1.442695, %v309_v59 }
 0x215   :  { %v336_v62 = vsel %vm281_vm2, %v1250_v60, 0.0 }
 0x216   :  { %1023 = vpow2.f32 %v320_v61  ;;  %337 = vadd.xlane.f32.xlu1 %v336_v62 }
 0x219   :  { %v284_v1 = vpop.xlane.xlu0 %283 }
 0x21a   :  { %v306_v24 = vsub.f32 %v159_v47, %v284_v1 }
 0x21c   :  { %v1256_v3 = vpop.eup %1023  ;;  %v314_v25 = vmul.f32 1.442695, %v306_v24 }
 0x21d   :  { %v339_v5 = vsel %vm281_vm2, %v1256_v3, 0.0 }
 0x21e   :  { %286 = vmax.xlane.f32.xlu1 %v285_v4  ;;  %340 = vadd.xlane.f32.xlu2 %v339_v5 }
 0x221   :  { %v296_v9 = vpop.xlane.xlu0 %295 }
 0x222   :  { %v310_v10 = vsub.f32 %v237_v50, %v296_v9 }
 0x224   :  { %v322_v13 = vmul.f32 1.442695, %v310_v10 }
 0x226   :  { %298 = vmax.xlane.f32.xlu1 %v297_v11  ;;  %1025 = vpow2.f32 %v322_v13 }
 0x229   :  { %v302_v15 = vpop.xlane.xlu0 %301 }
 0x22a   :  { %v312_v16 = vsub.f32 %v276_v53, %v302_v15 }
 0x22c   :  { %v326_v18 = vmul.f32 1.442695, %v312_v16  ;;  %v1267_v19 = vpop.eup %1025 }
 0x22d   :  { %v342_v21 = vsel %vm281_vm2, %v1267_v19, 0.0 }
 0x22e   :  { %304 = vmax.xlane.f32.xlu1 %v303_v17  ;;  %1027 = vpow2.f32 %v326_v18 }
 0x22f   :  { %1029 = vpow2.f32 %v314_v25 }
 0x234   :  { %v1276_v22 = vpop.eup %1027 }
 0x235   :  { %v348_v23 = vsel %vm281_vm2, %v1276_v22, 0.0  ;;  %v1280_v26 = vpop.eup %1029 }
 0x236   :  { %998 = vrot.lane.b32.xlu2 %v1270_v20, %s1089_s15  ;;  %343 = vadd.xlane.f32.xlu1 %v342_v21  ;;  %v330_v27 = vsel %vm281_vm2, %v1280_v26, 0.0 }
 0x23e   :  { %349 = vadd.xlane.f32.xlu1 %v348_v23 }
 0x25f   :  { %331 = vadd.xlane.f32.xlu2 %v330_v27 }
 0x289   :  { %v338_v28 = vpop.xlane.xlu1 %337 }
 0x28a   :  { %1031 = vrcp.f32 %v338_v28  ;;  %v393_v34 = vand.u32 2147483648, %v338_v28  ;;  %v391_v36 = vand.u32 2147483647, %v338_v28  ;;  %vm387_vm4 = vweird.f32 %v338_v28 }
 0x28c   :  { %v394_v39 = vor.u32 1.1754944e-38, %v393_v34  ;;  %vm392_vm6 = vcmp.eq.f32.partialorder %v391_v36, 8.507059e+37 }
 0x290   :  { %v1032_v29 = vpop.eup %1031 }
 0x291   :  { %v383_v30 = vmul.f32 %v1032_v29, %v338_v28  ;;  %v287_v31 = vpop.xlane.xlu1 %286  ;;  %v341_v32 = vpop.xlane.xlu2 %340  ;;  %vm388_vm3 = vweird.f32 %v1032_v29 }
 0x292   :  { %1033 = vrcp.f32 %v341_v32  ;;  %vm389_vm5 = vmor %vm387_vm4, %vm388_vm3  ;;  %v307_v48 = vsub.f32 %v1254_v0, %v287_v31  ;;  %v407_v49 = vand.u32 2147483648, %v341_v32  ;;  %v405_v54 = vand.u32 2147483647, %v341_v32 }
 0x293   :  { %v384_v33 = vsub.f32 1.0, %v383_v30  ;;  %vm401_vm8 = vweird.f32 %v341_v32 }
 0x294   :  { %v316_v56 = vmul.f32 1.442695, %v307_v48  ;;  %v408_v57 = vor.u32 1.1754944e-38, %v407_v49  ;;  %vm406_vm10 = vcmp.eq.f32.partialorder %v405_v54, 8.507059e+37 }
 0x295   :  { %v385_v35 = vmul.f32 %v1032_v29, %v384_v33 }
 0x297   :  { %v386_v37 = vadd.f32 %v1032_v29, %v385_v35 }
 0x298   :  { %v1034_v38 = vpop.eup %1033 }
 0x299   :  { %v397_v40 = vmul.f32 %v1034_v38, %v341_v32  ;;  %v299_v41 = vpop.xlane.xlu1 %298  ;;  %v999_v42 = vpop.permute.xlu2 %998  ;;  %v390_v43 = vsel %vm389_vm5, %v1032_v29, %v386_v37  ;;  %vm402_vm7 = vweird.f32 %v1034_v38 }
 0x29a   :  { %v311_v44 = vsub.f32 %v240_v8, %v299_v41  ;;  %v1000_v45 = vunpack.i.l.bf16 %v999_v42  ;;  %v395_v46 = vsel %vm392_vm6, %v394_v39, %v390_v43  ;;  %v1001_v51 = vunpack.i.h.bf16 %v999_v42  ;;  %vm403_vm9 = vmor %vm401_vm8, %vm402_vm7 }
 0x29b   :  { %v398_v47 = vsub.f32 1.0, %v397_v40  ;;  %v468_v53 = vmul.f32 %v1250_v60, %v395_v46 }
 0x29c   :  { %v324_v50 = vmul.f32 1.442695, %v311_v44  ;;  %532 = vmatpush.msrb.mxu3 %v1000_v45 }
 0x29d   :  { %v399_v52 = vmul.f32 %v1034_v38, %v398_v47 }
 0x29e   :  { %1035 = vpow2.f32 %v324_v50  ;;  %533 = vmatpush.msrb.mxu3 %v1001_v51 }
 0x29f   :  { %968 = vmatmul.msk.f32.vlgmr.msrb.gmra.mxu3 %vm281_vm2, %v468_v53  ;;  %v400_v55 = vadd.f32 %v1034_v38, %v399_v52  ;;  %1037 = vpow2.f32 %v316_v56 }
 0x2a1   :  { %v305_v58 = vpop.xlane.xlu1 %304  ;;  %v404_v59 = vsel %vm403_vm9, %v1034_v38, %v400_v55 }
 0x2a2   :  { %v313_v61 = vsub.f32 %v1263_v14, %v305_v58  ;;  %v409_v62 = vsel %vm406_vm10, %v408_v57, %v404_v59 }
 0x2a3   :  { %v469_v1 = vmul.f32 %v1256_v3, %v409_v62 }
 0x2a4   :  { %v1288_v63 = vpop.eup %1035  ;;  %v328_v60 = vmul.f32 1.442695, %v313_v61 }
 0x2a5   :  { %v345_v0 = vsel %vm281_vm2, %v1288_v63, 0.0  ;;  %v1294_v4 = vpop.eup %1037 }
 0x2a6   :  { %1039 = vpow2.f32 %v328_v60  ;;  %346 = vadd.xlane.f32.xlu0 %v345_v0  ;;  %v333_v6 = vsel %vm281_vm2, %v1294_v4, 0.0 }
 0x2a7   :  { %969 = vmatmul.msk.f32.gmra.mxu3 %vm281_vm2, %v469_v1 }
 0x2a9   :  { %v344_v23 = vpop.xlane.xlu1 %343 }
 0x2aa   :  { %vm415_vm3 = vweird.f32 %v344_v23  ;;  %v419_v50 = vand.u32 2147483647, %v344_v23  ;;  %v421_v52 = vand.u32 2147483648, %v344_v23 }
 0x2ac   :  { %v1296_v5 = vpop.eup %1039 }
 0x2ad   :  { %v351_v8 = vsel %vm281_vm2, %v1296_v5, 0.0 }
 0x2ae   :  { %334 = vadd.xlane.f32.xlu0 %v333_v6  ;;  %352 = vadd.xlane.f32.xlu1 %v351_v8  ;;  %v422_v6 = vor.u32 1.1754944e-38, %v421_v52 }
 0x2b1   :  { %v1313_v25 = vpop.xlane.xlu1 %349 }
 0x2b2   :  { %v449_v59 = vand.u32 2147483648, %v1313_v25  ;;  %vm443_vm10 = vweird.f32 %v1313_v25  ;;  %v447_v0 = vand.u32 2147483647, %v1313_v25 }
 0x2c2   :  { %1003 = vrot.lane.b32.xlu0 %v1270_v20, %s1093_s17 }
 0x2c7   :  { %1008 = vrot.lane.b32.xlu1 %v1270_v20, %s1095_s18  ;;  %v541_v20 = vld [vmem:[%s1470_s6 + $0x8] sm:$0xff] }
 0x2c8   :  { %563 = vmatpush.msra.mxu0 %v541_v20 }
 0x2d2   :  { %v332_v3 = vpop.xlane.xlu2 %331 }
 0x2d3   :  { %1041 = vrcp.f32 %v332_v3  ;;  %v365_v12 = vand.u32 2147483648, %v332_v3  ;;  %v363_v14 = vand.u32 2147483647, %v332_v3  ;;  %vm359_vm12 = vweird.f32 %v332_v3 }
 0x2d4   :  { %1043 = vrcp.f32 %v344_v23 }
 0x2d5   :  { %v366_v16 = vor.u32 1.1754944e-38, %v365_v12  ;;  %vm364_vm14 = vcmp.eq.f32.partialorder %v363_v14, 8.507059e+37  ;;  %1045 = vrcp.f32 %v1313_v25 }
 0x2d9   :  { %v1042_v9 = vpop.eup %1041 }
 0x2da   :  { %v355_v10 = vmul.f32 %v1042_v9, %v332_v3  ;;  %vm360_vm11 = vweird.f32 %v1042_v9  ;;  %v1044_v28 = vpop.eup %1043 }
 0x2db   :  { %vm361_vm13 = vmor %vm359_vm12, %vm360_vm11  ;;  %v411_v31 = vmul.f32 %v1044_v28, %v344_v23  ;;  %vm416_vm5 = vweird.f32 %v1044_v28  ;;  %vm420_vm12 = vcmp.eq.f32.partialorder %v419_v50, 8.507059e+37 }
 0x2dc   :  { %v356_v11 = vsub.f32 1.0, %v355_v10  ;;  %vm1332_vm9 = vmor %vm415_vm3, %vm416_vm5 }
 0x2dd   :  { %v412_v34 = vsub.f32 1.0, %v411_v31 }
 0x2de   :  { %v357_v13 = vmul.f32 %v1042_v9, %v356_v11  ;;  %v450_v11 = vor.u32 1.1754944e-38, %v449_v59 }
 0x2df   :  { %v413_v41 = vmul.f32 %v1044_v28, %v412_v34  ;;  %v635_v34 = vld [vmem:[%s1470_s6 + $0x10] sm:$0xff] }
 0x2e0   :  { %v358_v15 = vadd.f32 %v1042_v9, %v357_v13  ;;  %657 = vmatpush.msra.mxu3 %v635_v34 }
 0x2e1   :  { %v414_v49 = vadd.f32 %v1044_v28, %v413_v41 }
 0x2e2   :  { %v362_v17 = vsel %vm361_vm13, %v1042_v9, %v358_v15  ;;  %vm448_vm13 = vcmp.eq.f32.partialorder %v447_v0, 8.507059e+37 }
 0x2e3   :  { %v367_v18 = vsel %vm364_vm14, %v366_v16, %v362_v17  ;;  %v418_v60 = vsel %vm1332_vm9, %v1044_v28, %v414_v49 }
 0x2e4   :  { %v466_v21 = vmul.f32 %v1280_v26, %v367_v18  ;;  %v1046_v26 = vpop.eup %1045 }
 0x2e5   :  { %v439_v32 = vmul.f32 %v1046_v26, %v1313_v25  ;;  %vm444_vm8 = vweird.f32 %v1046_v26 }
 0x2e6   :  { %966 = vmatmul.msk.f32.vlgmr.msrb.gmra.mxu2 %vm281_vm2, %v466_v21  ;;  %vm445_vm11 = vmor %vm443_vm10, %vm444_vm8 }
 0x2e7   :  { %v440_v38 = vsub.f32 1.0, %v439_v32  ;;  %v503_v32 = vld [vmem:[%s1470_s6] sm:$0xff] }
 0x2e8   :  { %592 = vmatpush.msra.mxu1 %v503_v32 }
 0x2e9   :  { %v441_v46 = vmul.f32 %v1046_v26, %v440_v38 }
 0x2eb   :  { %v442_v55 = vadd.f32 %v1046_v26, %v441_v46 }
 0x2ed   :  { %v446_v3 = vsel %vm445_vm11, %v1046_v26, %v442_v55 }
 0x2ee   :  { %v451_v13 = vsel %vm448_vm13, %v450_v11, %v446_v3 }
 0x2ef   :  { %v472_v25 = vmul.f32 %v1276_v22, %v451_v13 }
 0x319   :  { %v1311_v24 = vpop.xlane.xlu0 %346 }
 0x31a   :  { %v435_v16 = vand.u32 2147483648, %v1311_v24  ;;  %vm429_vm3 = vweird.f32 %v1311_v24  ;;  %v433_v23 = vand.u32 2147483647, %v1311_v24 }
 0x31c   :  { %v436_v28 = vor.u32 1.1754944e-38, %v435_v16  ;;  %v798_v16 = vld [vmem:[%s1471_s7 + $0x10] sm:$0xff] }
 0x321   :  { %v335_v27 = vpop.xlane.xlu0 %334  ;;  %v1316_v30 = vpop.xlane.xlu1 %352 }
 0x322   :  { %v535_v29 = vpop.f32.mrf.mxu3  ;;  %1047 = vrcp.f32 %v335_v27  ;;  %v379_v42 = vand.u32 2147483648, %v335_v27  ;;  %v377_v45 = vand.u32 2147483647, %v335_v27  ;;  %vm373_vm4 = vweird.f32 %v335_v27 }
 0x323   :  { %970 = vmatmul.msk.f32.vlgmr.msra.gmra.mxu0 %vm132_vm1, %v535_v29  ;;  %1049 = vrcp.f32 %v1311_v24  ;;  %v463_v21 = vand.u32 2147483648, %v1316_v30 }
 0x324   :  { %1051 = vrcp.f32 %v1316_v30  ;;  %v380_v51 = vor.u32 1.1754944e-38, %v379_v42  ;;  %vm378_vm7 = vcmp.eq.f32.partialorder %v377_v45, 8.507059e+37 }
 0x325   :  { %v464_v26 = vor.u32 1.1754944e-38, %v463_v21 }
 0x328   :  { %v1048_v33 = vpop.eup %1047 }
 0x329   :  { %v369_v35 = vmul.f32 %v1048_v33, %v335_v27  ;;  %v1322_v37 = vpop.eup %1049  ;;  %vm374_vm15 = vweird.f32 %v1048_v33  ;;  %v461_v27 = vand.u32 2147483647, %v1316_v30 }
 0x32a   :  { %v538_v36 = vpop.f32.mrf.mxu3  ;;  %v1325_v39 = vpop.eup %1051  ;;  %v425_v43 = vmul.f32 %v1322_v37, %v1311_v24  ;;  %vm375_vm6 = vmor %vm373_vm4, %vm374_vm15  ;;  %vm430_vm14 = vweird.f32 %v1322_v37  ;;  %vm457_vm4 = vweird.f32 %v1316_v30 }
 0x32b   :  { %971 = vmatmul.msk.f32.gmra.mxu0 %vm132_vm1, %v538_v36  ;;  %v370_v40 = vsub.f32 1.0, %v369_v35  ;;  %v453_v47 = vmul.f32 %v1325_v39, %v1316_v30  ;;  %vm458_vm15 = vweird.f32 %v1325_v39  ;;  %vm431_vm5 = vmor %vm429_vm3, %vm430_vm14  ;;  %vm462_vm8 = vcmp.eq.f32.partialorder %v461_v27, 8.507059e+37  ;;  %v841_v27 = vld [vmem:[%s1473_s9 + $0x30] sm:$0xff] }
 0x32c   :  { %v426_v53 = vsub.f32 1.0, %v425_v43  ;;  %vm844_vm14 = vcmask 523264  }
 0x32d   :  { %v371_v44 = vmul.f32 %v1048_v33, %v370_v40  ;;  %v454_v56 = vsub.f32 1.0, %v453_v47  ;;  %v1014_v47 = vld [vmem:[%s1474_s10 + $0x1] ss:$0 sm:$0xff] }
 0x32e   :  { %v427_v8 = vmul.f32 %v1322_v37, %v426_v53 }
 0x32f   :  { %v372_v48 = vadd.f32 %v1048_v33, %v371_v44  ;;  %v455_v9 = vmul.f32 %v1325_v39, %v454_v56 }
 0x330   :  { %v428_v15 = vadd.f32 %v1322_v37, %v427_v8 }
 0x331   :  { %v376_v54 = vsel %vm375_vm6, %v1048_v33, %v372_v48  ;;  %v456_v18 = vadd.f32 %v1325_v39, %v455_v9  ;;  %vm459_vm6 = vmor %vm457_vm4, %vm458_vm15 }
 0x332   :  { %v381_v57 = vsel %vm378_vm7, %v380_v51, %v376_v54  ;;  %vm434_vm7 = vcmp.eq.f32.partialorder %v433_v23, 8.507059e+37 }
 0x333   :  { %v467_v62 = vmul.f32 %v1294_v4, %v381_v57  ;;  %v423_v4 = vsel %vm420_vm12, %v422_v6, %v418_v60  ;;  %v460_v29 = vsel %vm459_vm6, %v1325_v39, %v456_v18  ;;  %v796_v18 = vld [vmem:[%s1471_s7] sm:$0xff] }
 0x334   :  { %v1004_v61 = vpop.permute.xlu0 %1003  ;;  %v470_v17 = vmul.f32 %v1267_v19, %v423_v4  ;;  %v432_v19 = vsel %vm431_vm5, %v1322_v37, %v428_v15  ;;  %v465_v31 = vsel %vm462_vm8, %v464_v26, %v460_v29  ;;  %v799_v15 = vld [vmem:[%s1471_s7 + $0x18] sm:$0xff]  ;;  %v839_v26 = vld [vmem:[%s1473_s9 + $0x20] sm:$0xff] }
 0x335   :  { %v1005_v1 = vunpack.i.l.bf16 %v1004_v61  ;;  %967 = vmatmul.msk.f32.gmra.mxu2 %vm281_vm2, %v467_v62  ;;  %v1006_v10 = vunpack.i.h.bf16 %v1004_v61  ;;  %v437_v24 = vsel %vm434_vm7, %v436_v28, %v432_v19  ;;  %v473_v30 = vmul.f32 %v1296_v5, %v465_v31  ;;  %v840_v19 = vld [vmem:[%s1473_s9 + $0x28] sm:$0xff] }
 0x336   :  { %v471_v22 = vmul.f32 %v1288_v63, %v437_v24  ;;  %v702_v63 = vld [vmem:[%s1470_s6 + $0x18] sm:$0xff]  ;;  %v1096_v61 = vmov 32.0  }
 0x337   :  { %626 = vmatpush.msra.mxu2 %v1005_v1  ;;  %724 = vmatpush.msrb.mxu1 %v702_v63  ;;  %1053 = vrcp.f32 %v1096_v61  ;;  %v1018_v61 = vld [vmem:[%s1474_s10 + $0x2] ss:$0 sm:$0xff] }
 0x339   :  { %v1009_v12 = vpop.permute.xlu1 %1008  ;;  %627 = vmatpush.msra.mxu2 %v1006_v10 }
 0x33a   :  { %v1010_v14 = vunpack.i.l.bf16 %v1009_v12  ;;  %v1011_v20 = vunpack.i.h.bf16 %v1009_v12 }
 0x33b   :  { %822 = vmatpush.msrb.mxu2 %v799_v15 }
 0x33c   :  { %693 = vmatpush.msrb.mxu0 %v1010_v14 }
 0x33d   :  { %974 = vmatmul.msk.f32.vlgmr.msra.gmra.mxu2 %vm281_vm2, %v470_v17  ;;  %v1054_v62 = vpop.eup %1053  ;;  %v797_v17 = vld [vmem:[%s1471_s7 + $0x8] sm:$0xff] }
 0x33e   :  { %694 = vmatpush.msrb.mxu0 %v1011_v20  ;;  %v746_v60 = vmul.f32 32.0, %v1054_v62  ;;  %823 = vmatpush.msrb.mxu2 %v798_v16 }
 0x33f   :  { %978 = vmatmul.msk.f32.vlgmr.msrb.gmra.mxu0 %vm281_vm2, %v472_v25  ;;  %v842_v25 = vld [vmem:[%s1473_s9 + $0x38] sm:$0xff] }
 0x340   :  { %v747_v0 = vsub.f32 1.0, %v746_v60  ;;  %824 = vmatpush.msrb.mxu2 %v797_v17  ;;  %859 = vmatpush.msrb.mxu3 %v842_v25 }
 0x342   :  { %v748_v1 = vmul.f32 %v1054_v62, %v747_v0  ;;  %825 = vmatpush.msrb.mxu2 %v796_v18  ;;  %860 = vmatpush.msrb.mxu3 %v841_v27 }
 0x344   :  { %861 = vmatpush.msrb.mxu3 %v840_v19 }
 0x345   :  { %975 = vmatmul.msk.f32.gmra.mxu2 %vm281_vm2, %v471_v22  ;;  %v838_v22 = vld [vmem:[%s1473_s9 + $0x18] sm:$0xff] }
 0x346   :  { %862 = vmatpush.msrb.mxu3 %v839_v26 }
 0x347   :  { %979 = vmatmul.msk.f32.gmra.mxu0 %vm281_vm2, %v473_v30 }
 0x348   :  { %863 = vmatpush.msrb.mxu3 %v838_v22 }
 0x369   :  { %v497_v33 = vpop.f32.mrf.mxu2 }
 0x36a   :  { %972 = vmatmul.msk.f32.vlgmr.msra.gmra.mxu1 %vm132_vm1, %v497_v33 }
 0x3a0   :  { %v565_v5 = vpop.f32.mrf.mxu0 }
 0x3a8   :  { %v568_v35 = vpop.f32.mrf.mxu0 }
 0x3b8   :  { %v500_v36 = vpop.f32.mrf.mxu2 }
 0x3b9   :  { %973 = vmatmul.msk.f32.gmra.mxu1 %vm132_vm1, %v500_v36  ;;  %v1015_v36 = vld [vmem:[%s1474_s10 + $0x3] ss:$0 sm:$0xff] }
 0x3bc   :  { %v696_v37 = vpop.f32.mrf.mxu0 }
 0x3c0   :  { %v629_v38 = vpop.f32.mrf.mxu2 }
 0x3c1   :  { %976 = vmatmul.msk.f32.vlgmr.msra.gmra.mxu3 %vm132_vm1, %v629_v38  ;;  %980 = vmatmul.msk.f32.vlgmr.msrb.gmra.mxu1 %vm132_vm1, %v696_v37 }
 0x3c4   :  { %v699_v39 = vpop.f32.mrf.mxu0 }
 0x3c8   :  { %v632_v40 = vpop.f32.mrf.mxu2 }
 0x3c9   :  { %977 = vmatmul.msk.f32.gmra.mxu3 %vm132_vm1, %v632_v40  ;;  %981 = vmatmul.msk.f32.gmra.mxu1 %vm132_vm1, %v699_v39  ;;  %vm750_vm1 = vweird.f32 %v1054_v62  ;;  %v1016_v40 = vld [vmem:[%s1474_s10 + $0x4] ss:$0 sm:$0xff] }
 0x3e7   :  { %v594_v41 = vpop.f32.mrf.mxu1 }
 0x3e8   :  { %v595_v43 = vadd.f32 %v594_v41, %v565_v5 }
 0x436   :  { %v597_v42 = vpop.f32.mrf.mxu1 }
 0x437   :  { %v598_v50 = vadd.f32 %v597_v42, %v568_v35 }
 0x43e   :  { %v726_v44 = vpop.f32.mrf.mxu1 }
 0x444   :  { %v659_v45 = vpop.f32.mrf.mxu3 }
 0x445   :  { %v665_v46 = vadd.f32 %v659_v45, %v595_v43 }
 0x446   :  { %v729_v55 = vpop.f32.mrf.mxu1 }
 0x447   :  { %v732_v48 = vadd.f32 %v726_v44, %v665_v46 }
 0x449   :  { %v735_v49 = vadd.f32 %v1014_v47, %v732_v48 }
 0x44b   :  { %v737_v51 = vadd.f32 %v735_v49, %v1169_v2  ;;  %v749_v2 = vadd.f32 %v1054_v62, %v748_v1 }
 0x44c   :  { %v662_v52 = vpop.f32.mrf.mxu3 }
 0x44d   :  { %v666_v53 = vadd.f32 %v662_v52, %v598_v50  ;;  %v739_v54 = vsel %vm62_vm0, %v737_v51, 0.0  ;;  %v1387_v6 = vsel %vm750_vm1, %v1054_v62, %v749_v2  ;;  %v837_v50 = vld [vmem:[%s1473_s9 + $0x10] sm:$0xff]  ;;  %v835_v52 = vld [vmem:[%s1473_s9] sm:$0xff] }
 0x44e   :  { %740 = vadd.xlane.f32.xlu0 %v739_v54  ;;  %864 = vmatpush.msrb.mxu3 %v837_v50 }
 0x44f   :  { %v733_v56 = vadd.f32 %v729_v55, %v666_v53  ;;  %v1017_v53 = vld [vmem:[%s1472_s8] ss:$0 sm:$0xff] }
 0x451   :  { %v736_v57 = vadd.f32 %v1014_v47, %v733_v56 }
 0x453   :  { %v738_v58 = vadd.f32 %v736_v57, %v1185_v7 }
 0x455   :  { %v742_v59 = vsel %vm62_vm0, %v738_v58, 0.0 }
 0x456   :  { %743 = vadd.xlane.f32.xlu2 %v742_v59 }
 0x4c1   :  { %v741_v8 = vpop.xlane.xlu0 %740 }
 0x4c2   :  { %v752_v3 = vmul.f32 %v1387_v6, %v741_v8 }
 0x4c4   :  { %v754_v9 = vsub.f32 %v737_v51, %v752_v3  ;;  %v836_v51 = vld [vmem:[%s1473_s9 + $0x8] sm:$0xff] }
 0x4c5   :  { %865 = vmatpush.msrb.mxu3 %v836_v51 }
 0x4c6   :  { %v756_v10 = vmul.f32 %v754_v9, %v754_v9 }
 0x4c7   :  { %866 = vmatpush.msrb.mxu3 %v835_v52 }
 0x4c8   :  { %v758_v7 = vsel %vm62_vm0, %v756_v10, 0.0 }
 0x4c9   :  { %759 = vadd.xlane.f32.xlu2 %v758_v7  ;;  %v744_v4 = vpop.xlane.xlu2 %743 }
 0x4ca   :  { %v753_v11 = vmul.f32 %v1387_v6, %v744_v4 }
 0x4cc   :  { %v755_v12 = vsub.f32 %v738_v58, %v753_v11 }
 0x4ce   :  { %v757_v13 = vmul.f32 %v755_v12, %v755_v12 }
 0x4d0   :  { %v761_v14 = vsel %vm62_vm0, %v757_v13, 0.0 }
 0x4d1   :  { %762 = vadd.xlane.f32.xlu1 %v761_v14 }
 0x53c   :  { %v760_v21 = vpop.xlane.xlu2 %759 }
 0x53d   :  { %v764_v20 = vmul.f32 %v760_v21, %v1387_v6 }
 0x53f   :  { %v766_v23 = vadd.f32 1e-05, %v764_v20 }
 0x541   :  { %1055 = vrsqrt.f32 %v766_v23  ;;  %vm774_vm9 = vweird.f32 %v766_v23 }
 0x544   :  { %v763_v28 = vpop.xlane.xlu1 %762 }
 0x545   :  { %v765_v29 = vmul.f32 %v763_v28, %v1387_v6 }
 0x547   :  { %v1056_v24 = vpop.eup %1055  ;;  %v767_v31 = vadd.f32 1e-05, %v765_v29 }
 0x548   :  { %v769_v30 = vmul.f32 %v1056_v24, %v766_v23  ;;  %vm775_vm2 = vweird.f32 %v1056_v24 }
 0x549   :  { %1057 = vrsqrt.f32 %v767_v31  ;;  %vm776_vm10 = vmor %vm774_vm9, %vm775_vm2  ;;  %vm784_vm12 = vweird.f32 %v767_v31 }
 0x54a   :  { %v770_v32 = vmul.f32 %v1056_v24, %v769_v30 }
 0x54c   :  { %v771_v33 = vmul.f32 0.5, %v770_v32  ;;  %v1019_v32 = vld [vmem:[%s1474_s10 + $0x5] ss:$0 sm:$0xff] }
 0x54e   :  { %v772_v34 = vsub.f32 1.5, %v771_v33 }
 0x54f   :  { %v1058_v63 = vpop.eup %1057 }
 0x550   :  { %v773_v5 = vmul.f32 %v1056_v24, %v772_v34  ;;  %v779_v35 = vmul.f32 %v1058_v63, %v767_v31  ;;  %vm785_vm11 = vweird.f32 %v1058_v63 }
 0x551   :  { %vm786_vm13 = vmor %vm784_vm12, %vm785_vm11 }
 0x552   :  { %v777_v37 = vsel %vm776_vm10, %v1056_v24, %v773_v5  ;;  %v780_v38 = vmul.f32 %v1058_v63, %v779_v35 }
 0x553   :  { %v788_v39 = vmul.f32 %v777_v37, %v754_v9 }
 0x554   :  { %v781_v41 = vmul.f32 0.5, %v780_v38 }
 0x555   :  { %v791_v42 = vmul.f32 %v1015_v36, %v788_v39 }
 0x556   :  { %v782_v43 = vsub.f32 1.5, %v781_v41 }
 0x557   :  { %v794_v44 = vadd.f32 %v1016_v40, %v791_v42 }
 0x558   :  { %v783_v45 = vmul.f32 %v1058_v63, %v782_v43 }
 0x559   :  { %982 = vmatmul.msk.f32.vlgmr.msrb.gmra.mxu2 %vm62_vm0, %v794_v44 }
 0x55a   :  { %v787_v46 = vsel %vm786_vm13, %v1058_v63, %v783_v45  ;;  %v1020_v63 = vld [vmem:[%s1474_s10 + $0x6] ss:$0 sm:$0xff]  ;;  %s1098_s10 = smov 128  }
 0x55b   :  { %v789_v47 = vmul.f32 %v787_v46, %v755_v12 }
 0x55d   :  { %v792_v48 = vmul.f32 %v1015_v36, %v789_v47 }
 0x55f   :  { %v795_v49 = vadd.f32 %v1016_v40, %v792_v48 }
 0x561   :  { %983 = vmatmul.msk.f32.gmra.mxu2 %vm62_vm0, %v795_v49 }
 0x5dc   :  { %v827_v54 = vpop.f32.mrf.mxu2 }
 0x5dd   :  { %v828_v55 = vadd.f32 %v1017_v53, %v827_v54 }
 0x5df   :  { %v833_v56 = vmax.f32 %v828_v55, 0.0 }
 0x5e1   :  { %984 = vmatmul.msk.f32.vlgmr.msrb.gmra.mxu3 %vm844_vm14, %v833_v56 }
 0x5e4   :  { %v830_v57 = vpop.f32.mrf.mxu2 }
 0x5e5   :  { %v831_v58 = vadd.f32 %v1017_v53, %v830_v57 }
 0x5e7   :  { %v834_v59 = vmax.f32 %v831_v58, 0.0 }
 0x5e9   :  { %985 = vmatmul.msk.f32.gmra.mxu3 %vm844_vm14, %v834_v59 }
 0x664   :  { %v868_v62 = vpop.f32.mrf.mxu3 }
 0x665   :  { %v869_v60 = vadd.f32 %v1018_v61, %v868_v62 }
 0x667   :  { %v874_v0 = vadd.f32 %v869_v60, %v794_v44 }
 0x669   :  { %v876_v1 = vsel %vm62_vm0, %v874_v0, 0.0 }
 0x66a   :  { %877 = vadd.xlane.f32.xlu2 %v876_v1 }
 0x66c   :  { %v871_v2 = vpop.f32.mrf.mxu3 }
 0x66d   :  { %v872_v8 = vadd.f32 %v1018_v61, %v871_v2 }
 0x66f   :  { %v875_v3 = vadd.f32 %v872_v8, %v795_v49 }
 0x671   :  { %v879_v9 = vsel %vm62_vm0, %v875_v3, 0.0 }
 0x672   :  { %880 = vadd.xlane.f32.xlu2 %v879_v9 }
 0x6dd   :  { %v878_v10 = vpop.xlane.xlu2 %877 }
 0x6de   :  { %v882_v7 = vmul.f32 %v878_v10, %v1387_v6 }
 0x6e0   :  { %v884_v4 = vsub.f32 %v874_v0, %v882_v7 }
 0x6e2   :  { %v886_v11 = vmul.f32 %v884_v4, %v884_v4 }
 0x6e4   :  { %v888_v12 = vsel %vm62_vm0, %v886_v11, 0.0 }
 0x6e5   :  { %889 = vadd.xlane.f32.xlu2 %v888_v12  ;;  %v881_v13 = vpop.xlane.xlu2 %880 }
 0x6e6   :  { %v883_v14 = vmul.f32 %v881_v13, %v1387_v6 }
 0x6e8   :  { %v885_v15 = vsub.f32 %v875_v3, %v883_v14 }
 0x6ea   :  { %v887_v16 = vmul.f32 %v885_v15, %v885_v15 }
 0x6ec   :  { %v891_v17 = vsel %vm62_vm0, %v887_v16, 0.0 }
 0x6ed   :  { %892 = vadd.xlane.f32.xlu0 %v891_v17 }
 0x758   :  { %v890_v18 = vpop.xlane.xlu2 %889 }
 0x759   :  { %v894_v21 = vmul.f32 %v890_v18, %v1387_v6 }
 0x75b   :  { %v896_v20 = vadd.f32 1e-05, %v894_v21 }
 0x75d   :  { %1059 = vrsqrt.f32 %v896_v20  ;;  %vm904_vm3 = vweird.f32 %v896_v20 }
 0x760   :  { %v893_v23 = vpop.xlane.xlu0 %892 }
 0x761   :  { %v895_v25 = vmul.f32 %v893_v23, %v1387_v6 }
 0x763   :  { %v1060_v27 = vpop.eup %1059  ;;  %v897_v19 = vadd.f32 1e-05, %v895_v25 }
 0x764   :  { %v899_v28 = vmul.f32 %v1060_v27, %v896_v20  ;;  %vm905_vm15 = vweird.f32 %v1060_v27 }
 0x765   :  { %1061 = vrsqrt.f32 %v897_v19  ;;  %vm906_vm4 = vmor %vm904_vm3, %vm905_vm15  ;;  %vm914_vm6 = vweird.f32 %v897_v19 }
 0x766   :  { %v900_v29 = vmul.f32 %v1060_v27, %v899_v28 }
 0x768   :  { %v901_v26 = vmul.f32 0.5, %v900_v29 }
 0x76a   :  { %v902_v24 = vsub.f32 1.5, %v901_v26 }
 0x76b   :  { %v1062_v31 = vpop.eup %1061 }
 0x76c   :  { %v903_v22 = vmul.f32 %v1060_v27, %v902_v24  ;;  %v909_v30 = vmul.f32 %v1062_v31, %v897_v19  ;;  %vm915_vm5 = vweird.f32 %v1062_v31 }
 0x76d   :  { %vm916_vm7 = vmor %vm914_vm6, %vm915_vm5 }
 0x76e   :  { %v907_v33 = vsel %vm906_vm4, %v1060_v27, %v903_v22  ;;  %v910_v34 = vmul.f32 %v1062_v31, %v909_v30 }
 0x76f   :  { %v918_v6 = vmul.f32 %v907_v33, %v884_v4 }
 0x770   :  { %v911_v5 = vmul.f32 0.5, %v910_v34 }
 0x771   :  { %v921_v35 = vmul.f32 %v1019_v32, %v918_v6 }
 0x772   :  { %v912_v36 = vsub.f32 1.5, %v911_v5 }
 0x773   :  { %v924_v37 = vadd.f32 %v1020_v63, %v921_v35 }
 0x774   :  { %v913_v38 = vmul.f32 %v1062_v31, %v912_v36 }
 0x775   :  { %926 = vst.msk [vmem:[#allocation2] sm:$0xff] %vm62_vm0, %v924_v37 }
 0x776   :  { %v917_v39 = vsel %vm916_vm7, %v1062_v31, %v913_v38 }
 0x777   :  { %v919_v40 = vmul.f32 %v917_v39, %v885_v15 }
 0x779   :  { %v922_v41 = vmul.f32 %v1019_v32, %v919_v40 }
 0x77b   :  { %v925_v42 = vadd.f32 %v1020_v63, %v922_v41 }
 0x77d   :  { %927 = vst.msk [vmem:[#allocation2 + $0x8] sm:$0xff] %vm62_vm0, %v925_v42 }
 0x77e   :  { %940 = dma.vmem_to_hbm [thread:$0]  %s933_s25, 256, %s935_s27, [#allocation3], %s1098_s10, %s1098_s10, %s1099_s28  }
 0x77f   :  { %1087 = dma.done.wait [#allocation3], 256  }
 0x780   :  { %1088 = vsyncadd [#allocation3], 4294967040 }
 0x781   :  { %945 = vsyncpa [#allocation3], 1 }

</bundles_post_ra>
